<compile_context>
chip_gen: v5e
topology: v5e:2x2
jax: 0.10.0
libtpu: 0.0.40
codegen_flags: <defaults>
</compile_context>

<pallas_src>
import functools

import jax
import jax.numpy as jnp
from jax import lax
from jax.experimental import pallas as pl
from jax.experimental.pallas import tpu as pltpu

BN_EPS = 1e-5
_ROW_GRAIN = 16                 # sublane granularity safe for f32 and bf16 tiles
_DEFAULT_ROW_TILE = 512


def _round_up(x, m):
    return ((x + m - 1) // m) * m


def _vmem_capacity_bytes():
    try:
        info = pltpu.get_tpu_info()
        cap = getattr(info, "vmem_capacity_bytes", None)
        if cap:
            return int(cap)
    except Exception:
        pass
    return 64 * 1024 * 1024     # conservative fallback (v7x per-TensorCore)


# ---------------------------------------------------------------------------
# Pass 1: tiled Linear on the MXU (bf16 operands, f32 accumulate) + per-tile
#         partial BatchNorm statistics (sum, sum of squares) in f32.
# ---------------------------------------------------------------------------
def _matmul_stats_kernel(x_ref, w_ref, y_ref, stats_ref, *, n_rows, row_tile, mxu_dtype):
    i = pl.program_id(0)
    x = x_ref[...].astype(mxu_dtype)
    y = jnp.dot(x, w_ref[...], preferred_element_type=jnp.float32)   # (tn, Cout) f32
    y_ref[...] = y.astype(y_ref.dtype)                               # bf16 intermediate
    if n_rows % row_tile:
        # Mask the ragged last tile's (undefined) rows out of the batch stats.
        rows = lax.broadcasted_iota(jnp.int32, (row_tile, 1), 0) + i * row_tile
        y = jnp.where(rows < n_rows, y, 0.0)
    s1 = jnp.sum(y, axis=0, keepdims=True)
    s2 = jnp.sum(y * y, axis=0, keepdims=True)
    stats_ref[...] = jnp.concatenate([s1, s2], axis=0)[None]          # one assignment


# ---------------------------------------------------------------------------
# Pass 2: streaming y*scale + shift -> ReLU (+ residual) -> store (native dtype)
# ---------------------------------------------------------------------------
def _bn_relu_kernel(scale_ref, shift_ref, y_ref, o_ref):
    y = y_ref[...].astype(jnp.float32)
    out = jnp.maximum(y * scale_ref[...] + shift_ref[...], 0.0)
    o_ref[...] = out.astype(o_ref.dtype)


def _bn_relu_res_kernel(scale_ref, shift_ref, y_ref, res_ref, o_ref):
    y = y_ref[...].astype(jnp.float32)
    out = jnp.maximum(y * scale_ref[...] + shift_ref[...], 0.0)
    out = out + res_ref[...].astype(jnp.float32)
    o_ref[...] = out.astype(o_ref.dtype)


# ---------------------------------------------------------------------------
# Wrapper
# ---------------------------------------------------------------------------
def node_update_layer(ppi_out, weight, bias, gamma, beta, res=None, *,
                      block_rows=_DEFAULT_ROW_TILE,
                      mxu_dtype=jnp.bfloat16, y_dtype=jnp.bfloat16):
    """Forward pass of NodeUpdateLayer.

    ppi_out: (N, Cin)
    weight:  (Cout, Cin)   -- native nn.Linear layout
    bias:    (Cout,)       -- cancelled exactly by train-mode BN mean subtraction
    gamma, beta: (Cout,)   -- BatchNorm affine parameters
    res:     optional (N, Cout)
    """
    del bias  # exactly cancelled by BN's batch-mean subtraction (train-mode BN)

    n, c_in = ppi_out.shape
    c_out, c_in_w = weight.shape
    assert c_in_w == c_in, "weight shape must be (Cout, Cin)"
    out_dtype = ppi_out.dtype

    # One-time (grid-constant, amortized) weight prep: transpose to (Cin, Cout)
    # for the MXU-native contraction and cast to the MXU operand dtype.
    w_t = weight.T.astype(mxu_dtype)

    x_isz = ppi_out.dtype.itemsize
    w_isz = jnp.dtype(mxu_dtype).itemsize
    y_isz = jnp.dtype(y_dtype).itemsize
    o_isz = jnp.dtype(out_dtype).itemsize
    r_isz = res.dtype.itemsize if res is not None else 0

    def _vmem_estimate(tile):
        w_b = 2 * c_in * c_out * w_isz                       # double-buffered weight
        p1 = (2 * tile * c_in * x_isz + w_b + 2 * tile * c_out * y_isz
              + 2 * 2 * 8 * c_out * 4)                       # + stats blocks
        p2 = 2 * tile * c_out * (y_isz + r_isz + o_isz) + 4 * 8 * c_out * 4
        return max(p1, p2)

    # Row tiling: big tiles (pipeline overhead amortization), >=2 tiles so both
    # v7x TensorCores get work, shrunk to fit a generation-aware VMEM budget.
    cap = _vmem_capacity_bytes()
    budget = int(cap * 0.40)
    tn = min(int(block_rows), _round_up(n, _ROW_GRAIN))
    if pl.cdiv(n, tn) < 2 and n > _ROW_GRAIN:
        tn = _round_up(pl.cdiv(n, 2), _ROW_GRAIN)
    while tn > _ROW_GRAIN and _vmem_estimate(tn) > budget:
        tn = _round_up(tn // 2, _ROW_GRAIN)
    num_tiles = pl.cdiv(n, tn)
    vmem_limit = int(min(int(cap * 0.75),
                         max(32 * 1024 * 1024, 2 * _vmem_estimate(tn))))

    cparams = pltpu.CompilerParams(dimension_semantics=("parallel",),
                                   vmem_limit_bytes=vmem_limit)

    # -------- pass 1: Linear + per-tile partial BN stats --------------------
    kernel1 = functools.partial(_matmul_stats_kernel, n_rows=n, row_tile=tn,
                                mxu_dtype=mxu_dtype)
    y, stats = pl.pallas_call(
        kernel1,
        out_shape=(jax.ShapeDtypeStruct((n, c_out), y_dtype),
                   jax.ShapeDtypeStruct((num_tiles, 2, c_out), jnp.float32)),
        grid=(num_tiles,),
        in_specs=[
            pl.BlockSpec((tn, c_in), lambda i: (i, 0)),
            pl.BlockSpec((c_in, c_out), lambda i: (0, 0)),
        ],
        out_specs=(
            pl.BlockSpec((tn, c_out), lambda i: (i, 0)),
            pl.BlockSpec((1, 2, c_out), lambda i: (i, 0, 0)),
        ),
        compiler_params=cparams,
        cost_estimate=pl.CostEstimate(
            flops=2 * n * c_in * c_out,
            transcendentals=0,
            bytes_accessed=int(n * c_in * x_isz + c_in * c_out * w_isz
                               + n * c_out * y_isz + num_tiles * 2 * c_out * 4),
        ),
    )(ppi_out, w_t)

    # -------- tiny XLA glue: fold partial stats into BN scale/shift ---------
    inv_n = 1.0 / float(n)
    totals = jnp.sum(stats, axis=0)                             # (2, Cout)
    mean = totals[0] * inv_n
    var = jnp.maximum(totals[1] * inv_n - mean * mean, 0.0)     # biased batch var
    # TODO(synk): E[y^2]-E[y]^2 can cancel when |mean| >> std; switch to shifted
    #             per-tile sums if strongly biased activations matter.
    scale = (gamma.astype(jnp.float32) * lax.rsqrt(var + BN_EPS)).reshape(1, c_out)
    shift = (beta.astype(jnp.float32) - mean * scale[0]).reshape(1, c_out)

    # -------- pass 2: BN (precomputed scale/shift) + ReLU (+ residual) ------
    in_specs = [
        pl.BlockSpec((1, c_out), lambda i: (0, 0)),    # scale
        pl.BlockSpec((1, c_out), lambda i: (0, 0)),    # shift
        pl.BlockSpec((tn, c_out), lambda i: (i, 0)),   # y tile
    ]
    operands = [scale, shift, y]
    if res is not None:
        in_specs.append(pl.BlockSpec((tn, c_out), lambda i: (i, 0)))
        operands.append(res)                           # native dtype; cast in-kernel
        kernel2 = _bn_relu_res_kernel
    else:
        kernel2 = _bn_relu_kernel

    out = pl.pallas_call(
        kernel2,
        out_shape=jax.ShapeDtypeStruct((n, c_out), out_dtype),
        grid=(num_tiles,),
        in_specs=in_specs,
        out_specs=pl.BlockSpec((tn, c_out), lambda i: (i, 0)),
        compiler_params=cparams,
        cost_estimate=pl.CostEstimate(
            flops=(4 if res is not None else 3) * n * c_out,
            transcendentals=0,
            bytes_accessed=int(n * c_out * (y_isz + o_isz + r_isz) + 2 * c_out * 4),
        ),
    )(*operands)

    return out


# ---------------------------------------------------------------------------
# Pure-JAX reference (PyTorch module: train-mode BN, eval-mode dropout)
# ---------------------------------------------------------------------------
def _reference(ppi_out, weight, bias, gamma, beta, res):
    y = jnp.dot(ppi_out, weight.T, precision=jax.lax.Precision.HIGHEST) + bias
    mean = y.mean(axis=0, keepdims=True)
    var = ((y - mean) ** 2).mean(axis=0, keepdims=True)
    y = gamma * (y - mean) / jnp.sqrt(var + BN_EPS) + beta
    y = jnp.maximum(y, 0.0)
    if res is not None:
        y = y + res
    return y


if __name__ == "__main__":
    key = jax.random.PRNGKey(0)
    N, C_IN, C_OUT = 512, 128, 128

    k1, k2, k3, k4, k5, k6 = jax.random.split(key, 6)
    bound = 1.0 / (C_IN ** 0.5)
    ppi_out = jax.random.normal(k1, (N, C_IN), dtype=jnp.float32)
    weight = jax.random.uniform(k2, (C_OUT, C_IN), minval=-bound, maxval=bound, dtype=jnp.float32)
    bias = jax.random.uniform(k3, (C_OUT,), minval=-bound, maxval=bound, dtype=jnp.float32)
    gamma = jax.random.uniform(k5, (C_OUT,), minval=0.5, maxval=1.5, dtype=jnp.float32)
    beta = 0.1 * jax.random.normal(k6, (C_OUT,), dtype=jnp.float32)
    res = jax.random.normal(k4, (N, C_OUT), dtype=jnp.float32)

    ref = _reference(ppi_out, weight, bias, gamma, beta, res)
    ref_nr = _reference(ppi_out, weight, bias, gamma, beta, None)

    # Default bf16-MXU / bf16-intermediate path, with residual.
    out = jax.block_until_ready(node_update_layer(ppi_out, weight, bias, gamma, beta, res))
    assert out.shape == (N, C_OUT) and out.dtype == ppi_out.dtype
    assert jnp.allclose(out, ref, atol=5e-2, rtol=5e-2), "mismatch vs reference (bf16, res)"

    # Default path, no residual (dedicated kernel variant).
    out_nr = jax.block_until_ready(node_update_layer(ppi_out, weight, bias, gamma, beta, None))
    assert jnp.allclose(out_nr, ref_nr, atol=5e-2, rtol=5e-2), "mismatch vs reference (bf16, no res)"

    # Exact-f32 mode (MXU operands and intermediate y kept in f32): tight check.
    out32 = jax.block_until_ready(node_update_layer(
        ppi_out, weight, bias, gamma, beta, res,
        mxu_dtype=jnp.float32, y_dtype=jnp.float32))
    assert jnp.allclose(out32, ref, atol=2e-3, rtol=2e-3), "mismatch vs reference (f32, res)"

    # Ragged row count: exercises in-kernel masking of the BN stats and the
    # pad-free ragged last tile (reads undefined, writes dropped).
    N2 = 200
    x2 = jax.random.normal(jax.random.PRNGKey(1), (N2, C_IN), dtype=jnp.float32)
    r2 = jax.random.normal(jax.random.PRNGKey(2), (N2, C_OUT), dtype=jnp.float32)
    ref2 = _reference(x2, weight, bias, gamma, beta, r2)
    out2 = jax.block_until_ready(node_update_layer(x2, weight, bias, gamma, beta, r2))
    assert out2.shape == (N2, C_OUT)
    assert jnp.allclose(out2, ref2, atol=5e-2, rtol=5e-2), "mismatch vs reference (ragged rows)"

    print("KERNEL_OK")
</pallas_src>

<mosaic_0001>
module attributes {stable_mosaic.version = 11 : i64} {
  func.func @_matmul_stats_kernel(%arg0: i32, %arg1: memref<256x128xf32, #tpu.memory_space<vmem>>, %arg2: memref<128x128xbf16, #tpu.memory_space<vmem>>, %arg3: memref<256x128xbf16, #tpu.memory_space<vmem>>, %arg4: memref<1x2x128xf32, #tpu.memory_space<vmem>>) attributes {dimension_semantics = [#tpu.dimension_semantics<parallel>], iteration_bounds = array<i64: 2>, scalar_prefetch = 0 : i64, scratch_operands = 0 : i64, tpu.core_type = #tpu.core_type<tc>, window_params = [{transform_indices = @transform_0, window_bounds = array<i64: 256, 128>}, {pipeline_mode = #tpu.pipeline_mode<synchronous>, transform_indices = @transform_1, window_bounds = array<i64: 128, 128>}, {transform_indices = @transform_2, window_bounds = array<i64: 256, 128>}, {transform_indices = @transform_3, window_bounds = array<i64: 1, 2, 128>}]} {
    %c0 = arith.constant 0 : index
    %c0_0 = arith.constant 0 : index
    %0 = vector.load %arg1[%c0, %c0_0] : memref<256x128xf32, #tpu.memory_space<vmem>>, vector<256x128xf32>
    %1 = arith.truncf %0 : vector<256x128xf32> to vector<256x128xbf16>
    %c0_1 = arith.constant 0 : index
    %c0_2 = arith.constant 0 : index
    %2 = vector.load %arg2[%c0_1, %c0_2] : memref<128x128xbf16, #tpu.memory_space<vmem>>, vector<128x128xbf16>
    %cst = arith.constant dense<0.000000e+00> : vector<256x128xf32>
    %3 = tpu.matmul %1, %2, %cst {dimension_numbers = #tpu.dot_dimension_numbers<[1], [0], [0], [1], [0, 0, 1, 1], [], []>} : vector<256x128xbf16>, vector<128x128xbf16>, vector<256x128xf32> -> vector<256x128xf32>
    %4 = arith.truncf %3 : vector<256x128xf32> to vector<256x128xbf16>
    %c0_3 = arith.constant 0 : index
    %c0_4 = arith.constant 0 : index
    %5 = vector.load %arg3[%c0_3, %c0_4] : memref<256x128xbf16, #tpu.memory_space<vmem>>, vector<256x128xbf16>
    tpu.vector_store %arg3[%c0_3, %c0_4], %4 {strides = array<i32>} : memref<256x128xbf16, #tpu.memory_space<vmem>>, vector<256x128xbf16>,
    %cst_5 = arith.constant dense<0.000000e+00> : vector<128xf32>
    %6 = vector.multi_reduction <add>, %3, %cst_5 [0] : vector<256x128xf32> to vector<128xf32>
    %7 = vector.shape_cast %6 : vector<128xf32> to vector<1x128xf32>
    %8 = arith.mulf %3, %3 : vector<256x128xf32>
    %cst_6 = arith.constant dense<0.000000e+00> : vector<128xf32>
    %9 = vector.multi_reduction <add>, %8, %cst_6 [0] : vector<256x128xf32> to vector<128xf32>
    %10 = vector.shape_cast %9 : vector<128xf32> to vector<1x128xf32>
    %11 = tpu.concatenate %7, %10 in 0 : vector<1x128xf32>, vector<1x128xf32> -> vector<2x128xf32>
    %12 = vector.shape_cast %11 : vector<2x128xf32> to vector<1x2x128xf32>
    %c0_7 = arith.constant 0 : index
    %c0_8 = arith.constant 0 : index
    %c0_9 = arith.constant 0 : index
    %13 = vector.load %arg4[%c0_7, %c0_8, %c0_9] : memref<1x2x128xf32, #tpu.memory_space<vmem>>, vector<1x2x128xf32>
    tpu.vector_store %arg4[%c0_7, %c0_8, %c0_9], %12 {strides = array<i32>} : memref<1x2x128xf32, #tpu.memory_space<vmem>>, vector<1x2x128xf32>,
    return
  }
  func.func @transform_0(%arg0: i32) -> (i32, i32) {
    %c0_i32 = arith.constant 0 : i32
    %c0_i32_0 = arith.constant 0 : i32
    return %arg0, %c0_i32 : i32, i32
  }
  func.func @transform_1(%arg0: i32) -> (i32, i32) {
    %c0_i32 = arith.constant 0 : i32
    %c0_i32_0 = arith.constant 0 : i32
    %c0_i32_1 = arith.constant 0 : i32
    return %c0_i32, %c0_i32_0 : i32, i32
  }
  func.func @transform_2(%arg0: i32) -> (i32, i32) {
    %c0_i32 = arith.constant 0 : i32
    %c0_i32_0 = arith.constant 0 : i32
    return %arg0, %c0_i32 : i32, i32
  }
  func.func @transform_3(%arg0: i32) -> (i32, i32, i32) {
    %c0_i32 = arith.constant 0 : i32
    %c0_i32_0 = arith.constant 0 : i32
    %c0_i32_1 = arith.constant 0 : i32
    return %arg0, %c0_i32, %c0_i32_0 : i32, i32, i32
  }
}

</mosaic_0001>

<bundles_post_ra>
// kernel: tpu_custom_call.1
= control target key start
LH: loop header
LB: loop body
LE: loop exit
PB: predicated region body
PF: predicated region fallthrough
CT: control target
= control target key end

     0   :  { %9 = vsyncpa [#allocation3], 0  ;;  %s1534_s0 = inlined_call_operand.hbm [shape: f32[512,128], index: 0, kind: input, shape index: {}]   ;;  %s1535_s1 = inlined_call_operand.hbm [shape: bf16[128,128], index: 1, kind: input, shape index: {}]   ;;  %s1536_s2 = inlined_call_operand.hbm [shape: bf16[512,128], index: 2, kind: output, shape index: {0}]   ;;  %s1537_s3 = inlined_call_operand.hbm [shape: f32[2,2,128], index: 3, kind: output, shape index: {1}]  }
   0x1   :  { %11 = vsyncpa [#allocation3 + $0x1], 0 }
   0x2   :  { %12 = vsyncpa [#allocation6], 0 }
   0x3   :  { %13 = vsyncpa [#allocation4], 0 }
   0x4   :  { %15 = vsyncpa [#allocation4 + $0x1], 0 }
   0x5   :  { %16 = vsyncpa [#allocation9], 0 }
   0x6   :  { %18 = vsyncpa [#allocation9 + $0x1], 0  ;;  %s1185_s12 = smov 0   ;;  %s1187_s13 = smov 0  }
   0x7   :  { %s1189_s14 = smov 0   ;;  %s1191_s15 = smov 0  }
   0x8 LB: > { %s1206_s16 = sadd.s32 4294967295, %s1156_s15   ;;  %s746_s17 = sadd.s32 4294967294, %s1156_s15   ;;  %s1156_s15 = sphi %s1191_s15, %s1547_s15   ;;  %s1152_s14 = sphi %s1189_s14, %s1546_s14   ;;  %s1148_s13 = sphi %s1187_s13, %s1545_s13   ;;  %s1144_s12 = sphi %s1185_s12, %s1544_s12  }
   0x9   : > { %p44_p0 = scmp.ne.s32.totalorder %s1148_s13, %s1144_s12  ;;  %p45_p1 = scmp.eq.s32.totalorder %s1206_s16, 0 }
   0xa   : > { %p89_p2 = scmp.eq.s32.totalorder %s1206_s16, 1  ;;  %p95_p3 = scmp.eq.s32.totalorder %s746_s17, 1 }
   0xb   : > { %p1215_p4 = por %p45_p1, %p44_p0  ;;  %p747_p5 = scmp.ge.s32.totalorder %s1156_s15, 1 }
   0xc   : > { %p1220_p6 = por %p95_p3, %p44_p0  ;;  %p128_p7 = scmp.lt.s32.totalorder %s1156_s15, 3 }
   0xd   : > { %s139_s22 = sshll.u32 %s1535_s1, 4  ;;  %s1158_s24 = smov [#allocation5]   ;;  %s140_s22 = int_to_ptr.hbm [resolvable:$true] %s139_s22 }
   0xe   : > { %p1228_p8 = pnand %p747_p5, %p128_p7  ;;  %s141_s25 = sshll.u32 %s1158_s24, 4  ;;  %s142_s25 = int_to_ptr.vmem [resolvable:$true] %s141_s25 }
   0xf   : > { %s1238_s26 = sadd.s32 1, %s1156_s15   ;;  %s1159_s27 = smov 64  }
  0x10   : > { %p936_p9 = pneg %p1228_p8  ;;  %s1160_s28 = smov 4  }
  0x11   : > { %s28_s29 = ssub.s32 %s1156_s15, %s1238_s26  ;;  %s31_s30 = sadd.s32 1, %s1152_s14 }
  0x12   : > { %p937_p10 = pnand %p936_p9, %p45_p1  ;;  %p29_p12 = scmp.eq.s32.totalorder %s28_s29, 0 }
  0x13   : > { %p38_p13 = scmp.ne.s32.totalorder %s1152_s14, %s1148_s13  ;;  %p39_p0 = scmp.eq.s32.totalorder %s1156_s15, 0 }
  0x14   : > { %939 = dma.hbm_to_vmem [thread:$0]  (!%p937_p10), %s140_s22, 1024, %s142_s25, [#allocation6], %s1159_s27, %s1159_s27, %s1160_s28  }
  0x15   : > { %p952_p3 = scmp.lt.s32.totalorder %s1156_s15, 2  ;;  %p40_p5 = por %p39_p0, %p38_p13 }
  0x16   : > { %s1248_s4 = scalar_select %p29_p12, %s1152_s14, %s31_s30  }
  0x17   : > { %p1252_p7 = por %p89_p2, %p38_p13  ;;  %s155_s6 = sand.u32 1, %s1152_s14  }
  0x18   : > { %s797_s7 = sshll.u32 %s1156_s15, 8  ;;  %s750_s8 = sshll.u32 %s155_s6, 8 }
  0x19   : > { %s164_s11 = scalar_lea.hbm %s1534_s0, %s797_s7  ;;  %s159_s20 = scalar_lea.vmem [#allocation2], %s750_s8 }
  0x1a   : > { %s165_s17 = sshll.u32 %s164_s11, 4  ;;  %s167_s21 = sshll.u32 %s159_s20, 4  ;;  %s166_s17 = int_to_ptr.hbm [resolvable:$true] %s165_s17  ;;  %s168_s21 = int_to_ptr.vmem [resolvable:$true] %s167_s21 }
  0x1b   : > { %p1263_p9 = pnand %p952_p3, %p40_p5  ;;  %s156_s24 = scalar_lea.sflag [#allocation3], %s155_s6 }
  0x1c   : > { %s1024_s25 = sshra.s32 %s166_s17, 4  ;;  %s1031_s30 = scalar_lea.hbm %s1534_s0, 512  ;;  %s1025_s25 = int_to_ptr.hbm [resolvable:$true] %s1024_s25 }
  0x1d   : > { %s1026_s27 = scalar_lea.hbm %s1025_s25, 256  ;;  %p1028_p10 = pneg %p1263_p9 }
  0x1e   : > { %p1027_p2 = scmp.ne.s32.totalorder %s1025_s25, %s1026_s27  ;;  %p1032_p0 = scmp.lt.s32.totalorder %s1025_s25, %s1534_s0 }
  0x1f   : > { %p1033_p3 = scmp.lt.s32.totalorder %s1031_s30, %s1026_s27 }
  0x20   : > { %p1029_p12 = pnand %p1028_p10, %p1027_p2 }
  0x21   : > { %p1034_p5 = por %p1033_p3, %p1032_p0 }
  0x22   : > { %p1030_p13 = pneg %p1029_p12 }
  0x24   : > { %p1035_p11 = pnand %p1034_p5, %p1030_p13 }
  0x26   : > { %1038 = shalt.err (!%p1035_p11)
}
  0x27   : > { %s1161_s6 = smov 128   ;;  %s1162_s9 = smov 8  }
  0x28   : > { %943 = dma.hbm_to_vmem [thread:$0]  (!%p1263_p9), %s166_s17, 4096, %s168_s21, %s156_s24, %s1161_s6, %s1161_s6, %s1162_s9  }
  0x29   : > { %179 = sbr.rel (%p1228_p8) target bundleno = 331 (0x14b), region = 28  ;;  %s1280_s10 = sand.u32 (!%p1228_p8), 1, %s1148_s13  }
  0x2a   : > { %s754_s11 = sshll.u32 (!%p1228_p8), %s1280_s10, 8  ;;  %s182_s20 = scalar_lea.sflag (!%p1228_p8), [#allocation3], %s1280_s10 }
  0x2b   : > { %s1284_s25 = scalar_lea.vmem (!%p1228_p8), [#allocation2], %s754_s11 }
  0x2e   : > { %1127 = dma.done.wait (%p1215_p4), %s182_s20, 4096  }
  0x2f   : > { %1129 = vsyncadd (%p1215_p4), %s182_s20, 4294963200 }
  0x30   : > { %1131 = dma.done.wait (%p45_p1), [#allocation6], 1024  }
  0x31   : > { %1133 = vsyncadd (%p45_p1), [#allocation6], 4294966272  ;;  %v805_v0 = vld [vmem:[#allocation5 + $0x38] sm:$0xff]  ;;  %v804_v1 = vld [vmem:[#allocation5 + $0x30] sm:$0xff]  ;;  %s756_s18 = sshll.u32 %s1280_s10, 7  ;;  %s806_s17 = sshll.u32 %s1206_s16, 7 }
  0x32   : > { %333 = vmatpush.bf16.msra.mxu0 %v805_v0  ;;  %902 = vmatpush.bf16.msra.mxu1 %v805_v0  ;;  %v803_v2 = vld [vmem:[#allocation5 + $0x28] sm:$0xff]  ;;  %v802_v3 = vld [vmem:[#allocation5 + $0x20] sm:$0xff]  ;;  %v801_v4 = vld [vmem:[#allocation5 + $0x18] sm:$0xff]  ;;  %s1337_s23 = scalar_lea.vmem [#allocation7], %s756_s18  ;;  %s612_s24 = scalar_lea.hbm %s1536_s2, %s806_s17 }
  0x33   : > { %903 = vmatpush.bf16.msra.mxu2 %v805_v0  ;;  %904 = vmatpush.bf16.msra.mxu3 %v805_v0  ;;  %v800_v5 = vld [vmem:[#allocation5 + $0x10] sm:$0xff]  ;;  %v799_v6 = vld [vmem:[#allocation5 + $0x8] sm:$0xff]  ;;  %v798_v7 = vld [vmem:[#allocation5] sm:$0xff]  ;;  %s613_s27 = sshll.u32 %s1337_s23, 4  ;;  %s615_s28 = sshll.u32 %s612_s24, 4  ;;  %s1424_s27 = int_to_ptr.vmem [resolvable:$true] %s613_s27  ;;  %s1426_s28 = int_to_ptr.hbm [resolvable:$true] %s615_s28 }
  0x34   : > { %v221_v8 = vld [vmem:[%s1284_s25] sm:$0xff]  ;;  %v222_v9 = vld [vmem:[%s1284_s25 + $0x8] sm:$0xff]  ;;  %v223_v20 = vld [vmem:[%s1284_s25 + $0x10] sm:$0xff]  ;;  %s596_s29 = scalar_lea.sflag [#allocation4], %s1280_s10  ;;  %s1068_s30 = sshra.s32 %s1426_s28, 4  ;;  %s1069_s30 = int_to_ptr.hbm [resolvable:$true] %s1068_s30 }
  0x35   : > { %v229_v10 = vld [vmem:[%s1284_s25 + $0x40] sm:$0xff]  ;;  %v230_v11 = vld [vmem:[%s1284_s25 + $0x48] sm:$0xff]  ;;  %v253_v14 = vpack.c.bf16 %v222_v9, %v221_v8  ;;  %v224_v21 = vld [vmem:[%s1284_s25 + $0x18] sm:$0xff]  ;;  %s1070_s7 = scalar_lea.hbm %s1069_s30, 128  ;;  %s1074_s9 = scalar_lea.hbm %s1536_s2, 256 }
  0x36   : > { %334 = vmatpush.bf16.msra.mxu0 %v804_v1  ;;  %905 = vmatpush.bf16.msra.mxu1 %v804_v1  ;;  %v237_v12 = vld [vmem:[%s1284_s25 + $0x80] sm:$0xff]  ;;  %v238_v13 = vld [vmem:[%s1284_s25 + $0x88] sm:$0xff]  ;;  %v257_v15 = vpack.c.bf16 %v230_v11, %v229_v10  ;;  %v231_v22 = vld [vmem:[%s1284_s25 + $0x50] sm:$0xff]  ;;  %v254_v26 = vpack.c.bf16 %v224_v21, %v223_v20  ;;  %p1071_p1 = scmp.ne.s32.totalorder %s1069_s30, %s1070_s7  ;;  %p1075_p11 = scmp.lt.s32.totalorder %s1069_s30, %s1536_s2 }
  0x37   : > { %906 = vmatpush.bf16.msra.mxu2 %v804_v1  ;;  %907 = vmatpush.bf16.msra.mxu3 %v804_v1  ;;  %v261_v16 = vpack.c.bf16 %v238_v13, %v237_v12  ;;  %v245_v17 = vld [vmem:[%s1284_s25 + $0xc0] sm:$0xff]  ;;  %v246_v18 = vld [vmem:[%s1284_s25 + $0xc8] sm:$0xff]  ;;  %v232_v23 = vld [vmem:[%s1284_s25 + $0x58] sm:$0xff]  ;;  %p1076_p9 = scmp.lt.s32.totalorder %s1074_s9, %s1070_s7 }
  0x38   : > { %v265_v19 = vpack.c.bf16 %v246_v18, %v245_v17  ;;  %v239_v24 = vld [vmem:[%s1284_s25 + $0x90] sm:$0xff]  ;;  %v240_v25 = vld [vmem:[%s1284_s25 + $0x98] sm:$0xff]  ;;  %v258_v27 = vpack.c.bf16 %v232_v23, %v231_v22  ;;  %v225_v32 = vld [vmem:[%s1284_s25 + $0x20] sm:$0xff]  ;;  %p1072_p4 = pnand %p1071_p1, %p1252_p7 }
  0x39   : > { %v262_v28 = vpack.c.bf16 %v240_v25, %v239_v24  ;;  %v247_v29 = vld [vmem:[%s1284_s25 + $0xd0] sm:$0xff]  ;;  %v248_v30 = vld [vmem:[%s1284_s25 + $0xd8] sm:$0xff]  ;;  %v226_v33 = vld [vmem:[%s1284_s25 + $0x28] sm:$0xff]  ;;  %p1077_p2 = por %p1076_p9, %p1075_p11 }
  0x3a   : > { %335 = vmatpush.bf16.msra.mxu0 %v803_v2  ;;  %908 = vmatpush.bf16.msra.mxu1 %v803_v2  ;;  %v266_v31 = vpack.c.bf16 %v248_v30, %v247_v29  ;;  %v233_v34 = vld [vmem:[%s1284_s25 + $0x60] sm:$0xff]  ;;  %v234_v35 = vld [vmem:[%s1284_s25 + $0x68] sm:$0xff]  ;;  %v255_v38 = vpack.c.bf16 %v226_v33, %v225_v32  ;;  %v227_v44 = vld [vmem:[%s1284_s25 + $0x30] sm:$0xff]  ;;  %p1073_p8 = pneg %p1072_p4 }
  0x3b   : > { %909 = vmatpush.bf16.msra.mxu2 %v803_v2  ;;  %910 = vmatpush.bf16.msra.mxu3 %v803_v2  ;;  %v241_v36 = vld [vmem:[%s1284_s25 + $0xa0] sm:$0xff]  ;;  %v242_v37 = vld [vmem:[%s1284_s25 + $0xa8] sm:$0xff]  ;;  %v259_v39 = vpack.c.bf16 %v234_v35, %v233_v34  ;;  %v228_v45 = vld [vmem:[%s1284_s25 + $0x38] sm:$0xff] }
  0x3c   : > { %v249_v40 = vld [vmem:[%s1284_s25 + $0xe0] sm:$0xff]  ;;  %v250_v41 = vld [vmem:[%s1284_s25 + $0xe8] sm:$0xff]  ;;  %v263_v42 = vpack.c.bf16 %v242_v37, %v241_v36  ;;  %v235_v46 = vld [vmem:[%s1284_s25 + $0x70] sm:$0xff]  ;;  %v256_v50 = vpack.c.bf16 %v228_v45, %v227_v44  ;;  %p1078_p10 = pnand %p1077_p2, %p1073_p8 }
  0x3d   : > { %v267_v43 = vpack.c.bf16 %v250_v41, %v249_v40  ;;  %v236_v47 = vld [vmem:[%s1284_s25 + $0x78] sm:$0xff]  ;;  %v243_v48 = vld [vmem:[%s1284_s25 + $0xb0] sm:$0xff] }
  0x3e   : > { %336 = vmatpush.bf16.msra.mxu0 %v802_v3  ;;  %911 = vmatpush.bf16.msra.mxu1 %v802_v3  ;;  %v244_v49 = vld [vmem:[%s1284_s25 + $0xb8] sm:$0xff]  ;;  %v260_v51 = vpack.c.bf16 %v236_v47, %v235_v46  ;;  %v251_v52 = vld [vmem:[%s1284_s25 + $0xf0] sm:$0xff] }
  0x3f   : > { %912 = vmatpush.bf16.msra.mxu2 %v802_v3  ;;  %913 = vmatpush.bf16.msra.mxu3 %v802_v3  ;;  %v252_v53 = vld [vmem:[%s1284_s25 + $0xf8] sm:$0xff]  ;;  %v264_v54 = vpack.c.bf16 %v244_v49, %v243_v48 }
  0x40   : > { %v268_v55 = vpack.c.bf16 %v252_v53, %v251_v52 }
  0x42   : > { %337 = vmatpush.bf16.msra.mxu0 %v801_v4  ;;  %914 = vmatpush.bf16.msra.mxu1 %v801_v4 }
  0x43   : > { %915 = vmatpush.bf16.msra.mxu2 %v801_v4  ;;  %916 = vmatpush.bf16.msra.mxu3 %v801_v4 }
  0x46   : > { %338 = vmatpush.bf16.msra.mxu0 %v800_v5  ;;  %917 = vmatpush.bf16.msra.mxu1 %v800_v5 }
  0x47   : > { %918 = vmatpush.bf16.msra.mxu2 %v800_v5  ;;  %919 = vmatpush.bf16.msra.mxu3 %v800_v5 }
  0x4a   : > { %339 = vmatpush.bf16.msra.mxu0 %v799_v6  ;;  %920 = vmatpush.bf16.msra.mxu1 %v799_v6 }
  0x4b   : > { %921 = vmatpush.bf16.msra.mxu2 %v799_v6  ;;  %922 = vmatpush.bf16.msra.mxu3 %v799_v6 }
  0x4e   : > { %340 = vmatpush.bf16.msra.mxu0 %v798_v7  ;;  %923 = vmatpush.bf16.msra.mxu1 %v798_v7 }
  0x4f   : > { %924 = vmatpush.bf16.msra.mxu2 %v798_v7  ;;  %925 = vmatpush.bf16.msra.mxu3 %v798_v7 }
  0x51   : > { %341 = vmatmul.bf16.vlgmr.msra.gmra.mxu0 %v253_v14  ;;  %361 = vmatmul.bf16.vlgmr.msra.gmra.mxu1 %v257_v15 }
  0x52   : > { %381 = vmatmul.bf16.vlgmr.msra.gmra.mxu2 %v261_v16  ;;  %401 = vmatmul.bf16.vlgmr.msra.gmra.mxu3 %v265_v19 }
  0x61   : > { %346 = vmatmul.bf16.gmra.mxu0 %v254_v26  ;;  %366 = vmatmul.bf16.gmra.mxu1 %v258_v27 }
  0x62   : > { %386 = vmatmul.bf16.gmra.mxu2 %v262_v28  ;;  %406 = vmatmul.bf16.gmra.mxu3 %v266_v31 }
  0x71   : > { %351 = vmatmul.bf16.gmra.mxu0 %v255_v38  ;;  %371 = vmatmul.bf16.gmra.mxu1 %v259_v39 }
  0x72   : > { %391 = vmatmul.bf16.gmra.mxu2 %v263_v42  ;;  %411 = vmatmul.bf16.gmra.mxu3 %v267_v43 }
  0x81   : > { %356 = vmatmul.bf16.gmra.mxu0 %v256_v50  ;;  %376 = vmatmul.bf16.gmra.mxu1 %v260_v51 }
  0x82   : > { %396 = vmatmul.bf16.gmra.mxu2 %v264_v54  ;;  %416 = vmatmul.bf16.gmra.mxu3 %v268_v55 }
  0xce   : > { %v342_v56 = vpop.f32.mrf.mxu0  ;;  %v1326_v57 = vpop.f32.mrf.mxu1 }
  0xcf   : > { %v523_v25 = vmul.f32 %v342_v56, %v342_v56 }
  0xd5   : > { %v1329_v58 = vpop.f32.mrf.mxu2  ;;  %v1335_v63 = vpop.f32.mrf.mxu3 }
  0xd6   : > { %v344_v59 = vpop.f32.mrf.mxu0  ;;  %v1331_v60 = vpop.f32.mrf.mxu1 }
  0xd7   : > { %v810_v61 = vpack.c.bf16 %v344_v59, %v342_v56  ;;  %v830_v62 = vpack.c.bf16 %v1331_v60, %v1326_v57  ;;  %v524_v24 = vmul.f32 %v344_v59, %v344_v59  ;;  %v486_v27 = vadd.f32 %v344_v59, %v342_v56 }
  0xd8   : > { %v531_v59 = vmul.f32 %v1326_v57, %v1326_v57 }
  0xd9   : > { %811 = vst [vmem:[%s1337_s23] sm:$0xff] %v810_v61   ;;  %v555_v28 = vadd.f32 %v524_v24, %v523_v25 }
  0xda   : > { %890 = vst [vmem:[%s1337_s23 + $0x20] sm:$0xff] %v830_v62  }
  0xdd   : > { %v1341_v0 = vpop.f32.mrf.mxu2  ;;  %v1347_v4 = vpop.f32.mrf.mxu3 }
  0xde   : > { %v347_v1 = vpop.f32.mrf.mxu0  ;;  %v1343_v2 = vpop.f32.mrf.mxu1  ;;  %v850_v3 = vpack.c.bf16 %v1341_v0, %v1329_v58  ;;  %v870_v5 = vpack.c.bf16 %v1347_v4, %v1335_v63 }
  0xdf   : > { %v525_v26 = vmul.f32 %v347_v1, %v347_v1  ;;  %v487_v30 = vadd.f32 %v486_v27, %v347_v1 }
  0xe0   : > { %894 = vst [vmem:[%s1337_s23 + $0x40] sm:$0xff] %v850_v3  }
  0xe1   : > { %898 = vst [vmem:[%s1337_s23 + $0x60] sm:$0xff] %v870_v5   ;;  %v556_v32 = vadd.f32 %v555_v28, %v525_v26 }
  0xe5   : > { %v1353_v6 = vpop.f32.mrf.mxu2  ;;  %v1359_v11 = vpop.f32.mrf.mxu3 }
  0xe6   : > { %v349_v7 = vpop.f32.mrf.mxu0  ;;  %v1355_v8 = vpop.f32.mrf.mxu1 }
  0xe7   : > { %v815_v9 = vpack.c.bf16 %v349_v7, %v347_v1  ;;  %v835_v10 = vpack.c.bf16 %v1355_v8, %v1343_v2  ;;  %v526_v29 = vmul.f32 %v349_v7, %v349_v7  ;;  %v488_v37 = vadd.f32 %v487_v30, %v349_v7 }
  0xe8   : > { %v532_v1 = vmul.f32 %v1331_v60, %v1331_v60  ;;  %v533_v7 = vmul.f32 %v1343_v2, %v1343_v2 }
  0xe9   : > { %887 = vst [vmem:[%s1337_s23 + $0x8] sm:$0xff] %v815_v9   ;;  %v557_v39 = vadd.f32 %v556_v32, %v526_v29 }
  0xea   : > { %891 = vst [vmem:[%s1337_s23 + $0x28] sm:$0xff] %v835_v10  }
  0xed   : > { %v1363_v12 = vpop.f32.mrf.mxu2  ;;  %v1369_v16 = vpop.f32.mrf.mxu3 }
  0xee   : > { %v352_v13 = vpop.f32.mrf.mxu0  ;;  %v1365_v14 = vpop.f32.mrf.mxu1  ;;  %v855_v15 = vpack.c.bf16 %v1363_v12, %v1353_v6  ;;  %v875_v17 = vpack.c.bf16 %v1369_v16, %v1359_v11 }
  0xef   : > { %v527_v33 = vmul.f32 %v352_v13, %v352_v13  ;;  %v489_v42 = vadd.f32 %v488_v37, %v352_v13 }
  0xf0   : > { %895 = vst [vmem:[%s1337_s23 + $0x48] sm:$0xff] %v855_v15   ;;  %v534_v15 = vmul.f32 %v1355_v8, %v1355_v8 }
  0xf1   : > { %899 = vst [vmem:[%s1337_s23 + $0x68] sm:$0xff] %v875_v17   ;;  %v558_v43 = vadd.f32 %v557_v39, %v527_v33 }
  0xf5   : > { %v1375_v18 = vpop.f32.mrf.mxu2  ;;  %v1381_v23 = vpop.f32.mrf.mxu3 }
  0xf6   : > { %v354_v19 = vpop.f32.mrf.mxu0  ;;  %v1377_v20 = vpop.f32.mrf.mxu1 }
  0xf7   : > { %v820_v21 = vpack.c.bf16 %v354_v19, %v352_v13  ;;  %v840_v22 = vpack.c.bf16 %v1377_v20, %v1365_v14  ;;  %v528_v40 = vmul.f32 %v354_v19, %v354_v19  ;;  %v490_v45 = vadd.f32 %v489_v42, %v354_v19 }
  0xf9   : > { %888 = vst [vmem:[%s1337_s23 + $0x10] sm:$0xff] %v820_v21   ;;  %v559_v46 = vadd.f32 %v558_v43, %v528_v40  ;;  %v535_v21 = vmul.f32 %v1365_v14, %v1365_v14 }
  0xfa   : > { %892 = vst [vmem:[%s1337_s23 + $0x30] sm:$0xff] %v840_v22  }
  0xfd   : > { %v1385_v31 = vpop.f32.mrf.mxu2  ;;  %v1391_v38 = vpop.f32.mrf.mxu3 }
  0xfe   : > { %v357_v34 = vpop.f32.mrf.mxu0  ;;  %v1387_v35 = vpop.f32.mrf.mxu1  ;;  %v860_v36 = vpack.c.bf16 %v1385_v31, %v1375_v18  ;;  %v880_v41 = vpack.c.bf16 %v1391_v38, %v1381_v23 }
  0xff   : > { %v529_v44 = vmul.f32 %v357_v34, %v357_v34  ;;  %v491_v47 = vadd.f32 %v490_v45, %v357_v34 }
 0x100   : > { %896 = vst [vmem:[%s1337_s23 + $0x50] sm:$0xff] %v860_v36  }
 0x101   : > { %900 = vst [vmem:[%s1337_s23 + $0x70] sm:$0xff] %v880_v41   ;;  %v560_v49 = vadd.f32 %v559_v46, %v529_v44 }
 0x105   : > { %v1397_v48 = vpop.f32.mrf.mxu2  ;;  %v1401_v56 = vpop.f32.mrf.mxu3 }
 0x106   : > { %v359_v50 = vpop.f32.mrf.mxu0  ;;  %v379_v51 = vpop.f32.mrf.mxu1 }
 0x107   : > { %v825_v52 = vpack.c.bf16 %v359_v50, %v357_v34  ;;  %v492_v53 = vadd.f32 %v491_v47, %v359_v50  ;;  %v530_v54 = vmul.f32 %v359_v50, %v359_v50  ;;  %v845_v55 = vpack.c.bf16 %v379_v51, %v1387_v35 }
 0x109   : > { %889 = vst [vmem:[%s1337_s23 + $0x18] sm:$0xff] %v825_v52   ;;  %v493_v61 = vadd.f32 %v492_v53, %v1326_v57  ;;  %v561_v62 = vadd.f32 %v560_v49, %v530_v54 }
 0x10a   : > { %893 = vst [vmem:[%s1337_s23 + $0x38] sm:$0xff] %v845_v55  }
 0x10b   : > { %v494_v3 = vadd.f32 %v493_v61, %v1331_v60  ;;  %v562_v5 = vadd.f32 %v561_v62, %v531_v59 }
 0x10d   : > { %v495_v57 = vadd.f32 %v494_v3, %v1343_v2  ;;  %v563_v9 = vadd.f32 %v562_v5, %v532_v1  ;;  %v399_v10 = vpop.f32.mrf.mxu2  ;;  %v1422_v19 = vpop.f32.mrf.mxu3 }
 0x10e   : > { %v865_v13 = vpack.c.bf16 %v399_v10, %v1397_v48  ;;  %v885_v2 = vpack.c.bf16 %v1422_v19, %v1401_v56 }
 0x10f   : > { %v564_v17 = vadd.f32 %v563_v9, %v533_v7  ;;  %v496_v60 = vadd.f32 %v495_v57, %v1355_v8  ;;  %v536_v8 = vmul.f32 %v1377_v20, %v1377_v20 }
 0x110   : > { %897 = vst [vmem:[%s1337_s23 + $0x58] sm:$0xff] %v865_v13  }
 0x111   : > { %v497_v22 = vadd.f32 %v496_v60, %v1365_v14  ;;  %v565_v24 = vadd.f32 %v564_v17, %v534_v15  ;;  %901 = vst [vmem:[%s1337_s23 + $0x78] sm:$0xff] %v885_v2  }
 0x113   : > { %v498_v25 = vadd.f32 %v497_v22, %v1377_v20  ;;  %v566_v26 = vadd.f32 %v565_v24, %v535_v21 }
 0x114   : > { %1081 = shalt.err (!%p1078_p10)
}
 0x115   : > { %s1163_s25 = smov 64   ;;  %s1164_s18 = smov 4   ;;  %v499_v14 = vadd.f32 %v498_v25, %v1387_v35  ;;  %v537_v20 = vmul.f32 %v1387_v35, %v1387_v35  ;;  %v567_v27 = vadd.f32 %v566_v26, %v536_v8  ;;  %v538_v30 = vmul.f32 %v379_v51, %v379_v51 }
 0x116   : > { %932 = dma.vmem_to_hbm [thread:$0]  (%p1252_p7), %s1424_s27, 2048, %s1426_s28, %s596_s29, %s1163_s25, %s1163_s25, %s1164_s18   ;;  %v539_v32 = vmul.f32 %v1329_v58, %v1329_v58  ;;  %v540_v36 = vmul.f32 %v1341_v0, %v1341_v0  ;;  %v541_v40 = vmul.f32 %v1353_v6, %v1353_v6  ;;  %v542_v42 = vmul.f32 %v1363_v12, %v1363_v12 }
 0x117   : > { %v568_v28 = vadd.f32 %v567_v27, %v537_v20  ;;  %v500_v29 = vadd.f32 %v499_v14, %v379_v51  ;;  %v544_v47 = vmul.f32 %v1385_v31, %v1385_v31  ;;  %v545_v51 = vmul.f32 %v1397_v48, %v1397_v48  ;;  %s757_s23 = sshll.u32 %s1280_s10, 1  ;;  %s794_s17 = sshll.u32 %s1206_s16, 1 }
 0x118   : > { %v546_v53 = vmul.f32 %v399_v10, %v399_v10  ;;  %v547_v54 = vmul.f32 %v1335_v63, %v1335_v63  ;;  %v548_v59 = vmul.f32 %v1347_v4, %v1347_v4  ;;  %v549_v62 = vmul.f32 %v1359_v11, %v1359_v11  ;;  %s628_s24 = scalar_lea.hbm %s1537_s3, %s794_s17  ;;  %s218_s27 = scalar_lea.vmem [#allocation8], %s757_s23 }
 0x119   : > { %v501_v33 = vadd.f32 %v500_v29, %v1329_v58  ;;  %v569_v34 = vadd.f32 %v568_v28, %v538_v30  ;;  %v543_v58 = vmul.f32 %v1375_v18, %v1375_v18  ;;  %v550_v3 = vmul.f32 %v1369_v16, %v1369_v16  ;;  %s630_s28 = sshll.u32 %s218_s27, 4  ;;  %s632_s29 = sshll.u32 %s628_s24, 4  ;;  %s631_s28 = int_to_ptr.vmem [resolvable:$true] %s630_s28  ;;  %s633_s29 = int_to_ptr.hbm [resolvable:$true] %s632_s29 }
 0x11a   : > { %vm592_vm0 = vcmask 1040384   ;;  %s601_s16 = scalar_lea.sflag [#allocation9], %s1280_s10  ;;  %s1096_s30 = sshra.s32 %s633_s29, 4  ;;  %s1097_s30 = int_to_ptr.hbm [resolvable:$true] %s1096_s30 }
 0x11b   : > { %v502_v37 = vadd.f32 %v501_v33, %v1341_v0  ;;  %v570_v39 = vadd.f32 %v569_v34, %v539_v32  ;;  %s1098_s7 = scalar_lea.hbm %s1097_s30, 2  ;;  %s1102_s9 = scalar_lea.hbm %s1537_s3, 4 }
 0x11c   : > { %p1099_p12 = scmp.ne.s32.totalorder %s1097_s30, %s1098_s7  ;;  %p1103_p3 = scmp.lt.s32.totalorder %s1097_s30, %s1537_s3 }
 0x11d   : > { %v503_v35 = vadd.f32 %v502_v37, %v1353_v6  ;;  %v571_v41 = vadd.f32 %v570_v39, %v540_v36  ;;  %p1104_p5 = scmp.lt.s32.totalorder %s1102_s9, %s1098_s7 }
 0x11e   : > { %p1100_p13 = pnand %p1099_p12, %p1252_p7 }
 0x11f   : > { %v572_v43 = vadd.f32 %v571_v41, %v541_v40  ;;  %v504_v44 = vadd.f32 %v503_v35, %v1363_v12  ;;  %p1105_p1 = por %p1104_p5, %p1103_p3 }
 0x120   : > { %p1101_p0 = pneg %p1100_p13 }
 0x121   : > { %v505_v45 = vadd.f32 %v504_v44, %v1375_v18  ;;  %v573_v46 = vadd.f32 %v572_v43, %v542_v42 }
 0x122   : > { %p1106_p4 = pnand %p1105_p1, %p1101_p0 }
 0x123   : > { %v506_v0 = vadd.f32 %v505_v45, %v1385_v31  ;;  %v574_v49 = vadd.f32 %v573_v46, %v543_v58 }
 0x125   : > { %v575_v6 = vadd.f32 %v574_v49, %v544_v47  ;;  %v507_v50 = vadd.f32 %v506_v0, %v1397_v48 }
 0x127   : > { %v576_v52 = vadd.f32 %v575_v6, %v545_v51  ;;  %v508_v12 = vadd.f32 %v507_v50, %v399_v10 }
 0x129   : > { %v509_v18 = vadd.f32 %v508_v12, %v1335_v63  ;;  %v577_v55 = vadd.f32 %v576_v52, %v546_v53  ;;  %v551_v63 = vmul.f32 %v1381_v23, %v1381_v23 }
 0x12b   : > { %v510_v31 = vadd.f32 %v509_v18, %v1347_v4  ;;  %v578_v61 = vadd.f32 %v577_v55, %v547_v54 }
 0x12d   : > { %v511_v48 = vadd.f32 %v510_v31, %v1359_v11  ;;  %v579_v1 = vadd.f32 %v578_v61, %v548_v59  ;;  %v552_v11 = vmul.f32 %v1391_v38, %v1391_v38 }
 0x12f   : > { %v580_v5 = vadd.f32 %v579_v1, %v549_v62  ;;  %v512_v7 = vadd.f32 %v511_v48, %v1369_v16  ;;  %v553_v16 = vmul.f32 %v1401_v56, %v1401_v56 }
 0x131   : > { %v513_v57 = vadd.f32 %v512_v7, %v1381_v23  ;;  %v581_v9 = vadd.f32 %v580_v5, %v550_v3  ;;  %v554_v23 = vmul.f32 %v1422_v19, %v1422_v19 }
 0x133   : > { %v514_v4 = vadd.f32 %v513_v57, %v1391_v38  ;;  %v582_v10 = vadd.f32 %v581_v9, %v551_v63 }
 0x135   : > { %v583_v13 = vadd.f32 %v582_v10, %v552_v11  ;;  %v515_v15 = vadd.f32 %v514_v4, %v1401_v56 }
 0x137   : > { %v584_v17 = vadd.f32 %v583_v13, %v553_v16  ;;  %v516_v60 = vadd.f32 %v515_v15, %v1422_v19 }
 0x139   : > { %v517_v2 = vrot.slane %v516_v60, 4  ;;  %v585_v21 = vadd.f32 %v584_v17, %v554_v23 }
 0x13b   : > { %v518_v22 = vadd.f32 %v517_v2, %v516_v60  ;;  %v586_v24 = vrot.slane %v585_v21, 4 }
 0x13d   : > { %v519_v8 = vrot.slane %v518_v22, 2  ;;  %v587_v25 = vadd.f32 %v586_v24, %v585_v21 }
 0x13f   : > { %v520_v38 = vadd.f32 %v519_v8, %v518_v22  ;;  %v588_v26 = vrot.slane %v587_v25, 2 }
 0x141   : > { %v521_v56 = vrot.slane %v520_v38, 1  ;;  %v589_v14 = vadd.f32 %v588_v26, %v587_v25 }
 0x143   : > { %v590_v20 = vrot.slane %v589_v14, 1  ;;  %v522_v19 = vadd.f32 %v521_v56, %v520_v38 }
 0x145   : > { %v591_v27 = vadd.f32 %v590_v20, %v589_v14 }
 0x147   : > { %v593_v28 = vsel %vm592_vm0, %v522_v19, %v591_v27 }
 0x148   : > { %594 = vst [vmem:[%s218_s27] sm:$0x3] %v593_v28 }
 0x149   : > { %1109 = shalt.err (!%p1106_p4)
}
 0x14a   : > { %933 = dma.vmem_to_hbm [thread:$0]  (%p1252_p7), %s631_s28, 32, %s633_s29, %s601_s16  }
 0x14b PF: > { %s644_s10 = sand.u32 1, %s1144_s12   ;;  %p1543_p8 = scmp.ge.s32.totalorder %s1156_s15, 2 }
 0x14c   : > { %s645_s25 = scalar_lea.sflag [#allocation4], %s644_s10 }
 0x14d   : > { %p945_p11 = pnand %p1543_p8, %p1220_p6 }
 0x14f   : > { %p946_p9 = pneg %p945_p11 }
 0x151   : > { %1135 = dma.done.wait (%p946_p9), %s645_s25, 2048  }
 0x152   : > { %1137 = vsyncadd (%p946_p9), %s645_s25, 4294965248  ;;  %s655_s18 = scalar_lea.sflag [#allocation9], %s644_s10 }
 0x153   : > { %1139 = dma.done.wait (%p946_p9), %s655_s18, 32  }
 0x154   : > { %1141 = vsyncadd (%p946_p9), %s655_s18, 4294967264  ;;  %p21_p7 = scmp.ge.s32.totalorder %s1238_s26, 4   ;;  %s1544_s12 = smov %s1148_s13 }
 0x155   : > { %s1545_s13 = smov %s1152_s14  ;;  %s1546_s14 = smov %s1248_s4 }
 0x156   : > { %s1547_s15 = smov %s1238_s26  ;;  %23 = sbr.rel (!%p21_p7) target bundleno = 8 (0x8), region = 94 }
 0x15b   :  { %661 = vsyncpa [#allocation3], 1 }
 0x15c   :  { %663 = vsyncpa [#allocation3 + $0x1], 1 }
 0x15d   :  { %664 = vsyncpa [#allocation6], 1 }
 0x15e   :  { %665 = vsyncpa [#allocation4], 1 }
 0x15f   :  { %667 = vsyncpa [#allocation4 + $0x1], 1 }
 0x160   :  { %668 = vsyncpa [#allocation9], 1 }
 0x161   :  { %670 = vsyncpa [#allocation9 + $0x1], 1 }

</bundles_post_ra>
